<compile_context>
chip_gen: v7x
topology: tpu7x:2x2x1
jax: 0.10.0
libtpu: 0.0.40
codegen_flags: <defaults>
</compile_context>

<pallas_src>
import functools
import math

import jax
import jax.numpy as jnp
from jax.experimental import pallas as pl
from jax.experimental.pallas import tpu as pltpu

BN_EPS = 1e-5
LANE = 128


def _round_up(x, m):
    return ((x + m - 1) // m) * m


def _tpu_vmem_capacity():
    try:
        return int(pltpu.get_tpu_info().vmem_capacity_bytes)
    except Exception:
        return 64 * 1024 * 1024  # conservative (v7x per-TensorCore VMEM)


def _vmem_ceiling(cap):
    # leave >=24 MiB headroom for compiler-internal scratch / semaphores / out buffers
    return max(cap - (24 << 20), cap // 2)    # 64 MiB -> 40 MiB, 128 MiB -> 104 MiB


def _vmem_limit_bytes(est, cap=None):
    cap = _tpu_vmem_capacity() if cap is None else cap
    return int(min(max(2 * est, 16 << 20), _vmem_ceiling(cap)))


def _i8_to_bf16(x):
    # explicit two-step convert (si8 -> f32 -> bf16); cheap on the VPU, hidden under DMA
    return x.astype(jnp.float32).astype(jnp.bfloat16)


# ------------------- stage 1 (large-N path): HW = H @ W_eff, all bf16 -------------------
def _xform_kernel(h_ref, w_ref, o_ref):
    o_ref[...] = jnp.dot(h_ref[...], w_ref[...],
                         preferred_element_type=jnp.float32).astype(o_ref.dtype)


def feature_transform(h, w, *, tm):
    """h: [N_pad, Fin_p] bf16, w: [Fin_p, Fout_p] bf16 (BN-folded) -> [N_pad, Fout_p] bf16."""
    n_pad, fin_p = h.shape
    fout_p = w.shape[1]
    est = 2 * (tm * fin_p * 2) + 2 * (fin_p * fout_p * 2) + 2 * (tm * fout_p * 2)
    return pl.pallas_call(
        _xform_kernel,
        out_shape=jax.ShapeDtypeStruct((n_pad, fout_p), jnp.bfloat16),
        grid=(n_pad // tm,),
        in_specs=[pl.BlockSpec((tm, fin_p), lambda i: (i, 0)),
                  pl.BlockSpec((fin_p, fout_p), lambda i: (0, 0))],   # constant block
        out_specs=pl.BlockSpec((tm, fout_p), lambda i: (i, 0)),
        compiler_params=pltpu.CompilerParams(
            dimension_semantics=("parallel",),
            vmem_limit_bytes=_vmem_limit_bytes(est)),
    )(h, w)


# ----- stage 2 (large-N path): K-tiled aggregation + fused epilogue (norm/BN/relu/res) -----
def _agg_kernel(adj_ref, hw_ref, b_ref, shift_ref, rs_ref, sn_ref, *rest,
                apply_relu, residual, graph_norm, batch_norm):
    if residual:
        hin_ref, out_ref, acc_ref = rest
    else:
        out_ref, acc_ref = rest

    k = pl.program_id(1)

    @pl.when(k == 0)
    def _():
        acc_ref[...] = jnp.zeros_like(acc_ref)

    # 0/1 int8 adjacency column-block, upcast to bf16 for the MXU; accumulate in f32.
    acc_ref[...] += jnp.dot(_i8_to_bf16(adj_ref[...]), hw_ref[...],
                            preferred_element_type=jnp.float32)

    @pl.when(k == pl.num_programs(1) - 1)
    def _():
        z = acc_ref[...] * rs_ref[...]        # exact f32 1/deg -> mean aggregation
        z = z + b_ref[...]
        if graph_norm:
            z = z * sn_ref[...]
        if batch_norm:
            z = z + shift_ref[...]            # BN shift = beta - mean * scale
        if apply_relu:
            z = jnp.maximum(z, 0.0)
        if residual:
            z = z + hin_ref[...].astype(jnp.float32)
        out_ref[...] = z.astype(out_ref.dtype)


def aggregate(adj_i8, hw, b, shift, rowscale, snorm, h_in, *, tm, tk,
              apply_relu, residual, graph_norm, batch_norm, out_dtype):
    n_pad = adj_i8.shape[0]
    fout_p = hw.shape[1]
    kernel = functools.partial(_agg_kernel, apply_relu=apply_relu, residual=residual,
                               graph_norm=graph_norm, batch_norm=batch_norm)
    in_specs = [
        pl.BlockSpec((tm, tk), lambda i, k: (i, k)),        # int8 adjacency tile
        pl.BlockSpec((tk, fout_p), lambda i, k: (k, 0)),    # HW column block
        pl.BlockSpec((1, fout_p), lambda i, k: (0, 0)),     # bias (BN-folded)
        pl.BlockSpec((1, fout_p), lambda i, k: (0, 0)),     # BN shift
        pl.BlockSpec((tm, 1), lambda i, k: (i, 0)),         # 1/deg row scale (f32, exact)
        pl.BlockSpec((tm, 1), lambda i, k: (i, 0)),         # snorm_n row tile
    ]
    args = [adj_i8, hw, b, shift, rowscale, snorm]
    if residual:
        in_specs.append(pl.BlockSpec((tm, fout_p), lambda i, k: (i, 0)))
        args.append(h_in)

    out_bytes = jnp.dtype(out_dtype).itemsize
    est = (2 * tm * tk * 1 + 2 * tk * fout_p * 2 + tm * fout_p * 4
           + 2 * tm * fout_p * out_bytes + 2 * tm * fout_p * 2 + (1 << 20))
    return pl.pallas_call(
        kernel,
        out_shape=jax.ShapeDtypeStruct((n_pad, fout_p), out_dtype),
        grid=(n_pad // tm, n_pad // tk),
        in_specs=in_specs,
        out_specs=pl.BlockSpec((tm, fout_p), lambda i, k: (i, 0)),
        scratch_shapes=[pltpu.VMEM((tm, fout_p), jnp.float32)],
        compiler_params=pltpu.CompilerParams(
            dimension_semantics=("parallel", "arbitrary"),
            vmem_limit_bytes=_vmem_limit_bytes(est)),
    )(*args)


# ------------- fused per-layer kernel (small graphs): transform + aggregate + epilogue -------------
def _fused_kernel(adj_ref, h_ref, w_ref, b_ref, shift_ref, rs_ref, sn_ref, out_ref,
                  *, apply_relu, residual, graph_norm, batch_norm):
    hw = jnp.dot(h_ref[...], w_ref[...],
                 preferred_element_type=jnp.float32).astype(jnp.bfloat16)
    z = jnp.dot(_i8_to_bf16(adj_ref[...]), hw, preferred_element_type=jnp.float32)
    z = z * rs_ref[...]                       # exact f32 1/deg -> mean aggregation
    z = z + b_ref[...]
    if graph_norm:
        z = z * sn_ref[...]
    if batch_norm:
        z = z + shift_ref[...]
    if apply_relu:
        z = jnp.maximum(z, 0.0)
    if residual:                              # only when F_in == F_out; h_ref IS h_in
        z = z + h_ref[...].astype(jnp.float32)
    out_ref[...] = z.astype(out_ref.dtype)


def fused_layer(adj_i8, h, w, b, shift, rowscale, snorm, *, apply_relu, residual,
                graph_norm, batch_norm, out_dtype):
    n_pad = adj_i8.shape[0]
    fin_p = h.shape[1]
    fout_p = w.shape[1]
    kernel = functools.partial(_fused_kernel, apply_relu=apply_relu, residual=residual,
                               graph_norm=graph_norm, batch_norm=batch_norm)
    est = (n_pad * n_pad + n_pad * fin_p * 2 + fin_p * fout_p * 2
           + 3 * n_pad * fout_p * 4 + (1 << 20))
    return pl.pallas_call(
        kernel,
        out_shape=jax.ShapeDtypeStruct((n_pad, fout_p), out_dtype),
        grid=(1,),
        in_specs=[
            pl.BlockSpec((n_pad, n_pad), lambda i: (0, 0)),
            pl.BlockSpec((n_pad, fin_p), lambda i: (0, 0)),
            pl.BlockSpec((fin_p, fout_p), lambda i: (0, 0)),
            pl.BlockSpec((1, fout_p), lambda i: (0, 0)),
            pl.BlockSpec((1, fout_p), lambda i: (0, 0)),
            pl.BlockSpec((n_pad, 1), lambda i: (0, 0)),
            pl.BlockSpec((n_pad, 1), lambda i: (0, 0)),
        ],
        out_specs=pl.BlockSpec((n_pad, fout_p), lambda i: (0, 0)),
        compiler_params=pltpu.CompilerParams(
            dimension_semantics=("arbitrary",),
            vmem_limit_bytes=_vmem_limit_bytes(est)),
    )(adj_i8, h, w, b, shift, rowscale, snorm)


# ------------------------------- parameter handling -------------------------------
def build_gcn_params(key, net_params):
    in_dim = net_params['in_dim']
    hidden = net_params['hidden_dim']
    n_classes = net_params['n_classes']
    n_layers = net_params['L']
    residual = net_params['residual']

    dims = [(in_dim, hidden, True)]
    dims += [(hidden, hidden, True) for _ in range(n_layers - 1)]
    dims += [(hidden, n_classes, False)]     # last layer: activation=None

    params = []
    for (fin, fout, relu) in dims:
        key, k1, k2, k3, k4, k5, k6 = jax.random.split(key, 7)
        bound = 1.0 / math.sqrt(fin)         # PyTorch nn.Linear default init
        w = jax.random.uniform(k1, (fin, fout), jnp.float32, -bound, bound)
        b = jax.random.uniform(k2, (1, fout), jnp.float32, -bound, bound)
        # non-trivial BN "trained" state to exercise the host-side folding
        gamma = jax.random.uniform(k3, (1, fout), jnp.float32, 0.8, 1.2)
        beta = 0.1 * jax.random.normal(k4, (1, fout), jnp.float32)
        rmean = 0.1 * jax.random.normal(k5, (1, fout), jnp.float32)
        rvar = jax.random.uniform(k6, (1, fout), jnp.float32, 0.5, 1.5)
        params.append(dict(w=w, b=b, gamma=gamma, beta=beta, rmean=rmean,
                           rvar=rvar, relu=relu,
                           residual=residual and (fin == fout)))
    return params


def fold_and_pad_layer(p, batch_norm):
    """Fold eval-mode BatchNorm into W/b (f32), cast W to bf16, zero-pad to 128 lanes."""
    w, b = p['w'], p['b']
    fin, fout = w.shape
    if batch_norm:
        scale = p['gamma'] / jnp.sqrt(p['rvar'] + BN_EPS)       # [1, fout]
        w_eff = w * scale
        b_eff = b * scale
        shift = p['beta'] - p['rmean'] * scale
    else:
        w_eff, b_eff = w, b
        shift = jnp.zeros((1, fout), jnp.float32)
    fin_p, fout_p = _round_up(fin, LANE), _round_up(fout, LANE)
    w_p = jnp.zeros((fin_p, fout_p), jnp.float32).at[:fin, :fout].set(w_eff)
    b_p = jnp.zeros((1, fout_p), jnp.float32).at[:, :fout].set(b_eff)
    s_p = jnp.zeros((1, fout_p), jnp.float32).at[:, :fout].set(shift)
    return dict(w=w_p.astype(jnp.bfloat16), b=b_p, shift=s_p,
                relu=p['relu'], residual=p['residual'])


# --------------------------------- forward pass ---------------------------------
def gcn_net_forward(adj_mask, h, snorm_n, layers, net_params, *,
                    force_tiled=False, tm=None, tk=None):
    """adj_mask: [N, N] binary adjacency (with self-loops). Mean aggregation is
    rowscale * (adj_mask @ h) with rowscale = 1/deg kept as an exact f32 vector."""
    n = h.shape[0]
    cap = _tpu_vmem_capacity()

    # ---- decide fused (small graph, one grid step) vs. tiled path ----
    fin_max = max(l['w'].shape[0] for l in layers)
    fout_max = max(l['w'].shape[1] for l in layers)
    n_pad_small = _round_up(max(n, LANE), LANE)
    fused_est = (n_pad_small * n_pad_small + 2 * n_pad_small * fin_max * 2
                 + fin_max * fout_max * 2 + 3 * n_pad_small * fout_max * 4)
    use_fused = (not force_tiled) and (n <= 2048) and (2 * fused_est <= _vmem_ceiling(cap))

    if use_fused:
        n_pad = n_pad_small
    else:
        if tm is None:
            tm = 512 if cap >= (100 << 20) else 256   # v5e/v6e: 512-row tiles, v7x: 256
        if tk is None:
            tk = 512                                  # adjacency column block
        n_pad = _round_up(n, max(tm, tk))
        tm = min(tm, n_pad)
        tk = min(tk, n_pad)

    # ---- graph tensors built once and reused by every layer ----
    mask_f = (adj_mask > 0).astype(jnp.float32)
    deg = jnp.sum(mask_f, axis=1, keepdims=True)
    rowscale = jnp.where(deg > 0, 1.0 / jnp.maximum(deg, 1.0), 0.0)   # exact mean scale

    adj_p = jnp.zeros((n_pad, n_pad), jnp.int8).at[:n, :n].set(mask_f.astype(jnp.int8))
    rs_p = jnp.zeros((n_pad, 1), jnp.float32).at[:n].set(rowscale)
    sn_p = jnp.zeros((n_pad, 1), jnp.float32).at[:n].set(snorm_n)

    fin0 = h.shape[1]
    fin0_p = layers[0]['w'].shape[0]
    h_p = jnp.zeros((n_pad, fin0_p), jnp.bfloat16).at[:n, :fin0].set(h.astype(jnp.bfloat16))

    # NOTE: padded rows pick up bias/shift garbage but never pollute real rows
    # (their adjacency columns and rowscale are zero) and are sliced off below.
    n_layers = len(layers)
    for li, lyr in enumerate(layers):
        out_dtype = jnp.float32 if li == n_layers - 1 else jnp.bfloat16
        if use_fused:
            h_p = fused_layer(adj_p, h_p, lyr['w'], lyr['b'], lyr['shift'], rs_p, sn_p,
                              apply_relu=lyr['relu'], residual=lyr['residual'],
                              graph_norm=net_params['graph_norm'],
                              batch_norm=net_params['batch_norm'],
                              out_dtype=out_dtype)
        else:
            hw = feature_transform(h_p, lyr['w'], tm=tm)          # bf16 H @ bf16 W_eff
            h_p = aggregate(adj_p, hw, lyr['b'], lyr['shift'], rs_p, sn_p, h_p,
                            tm=tm, tk=tk,
                            apply_relu=lyr['relu'], residual=lyr['residual'],
                            graph_norm=net_params['graph_norm'],
                            batch_norm=net_params['batch_norm'],
                            out_dtype=out_dtype)
        # dropout / in_feat_dropout are identity at inference
    return h_p[:n, :net_params['n_classes']].astype(jnp.float32)


# -------------------------------- pure-JAX reference --------------------------------
def gcn_ref(adj_norm, h, snorm, params_raw, net_params):
    for p in params_raw:
        h_in = h
        agg = adj_norm @ h
        z = agg @ p['w'] + p['b']
        if net_params['graph_norm']:
            z = z * snorm
        if net_params['batch_norm']:
            inv = 1.0 / jnp.sqrt(p['rvar'] + BN_EPS)
            z = p['gamma'] * (z - p['rmean']) * inv + p['beta']
        if p['relu']:
            z = jnp.maximum(z, 0.0)
        if p['residual']:
            z = h_in + z
        h = z
    return h


if __name__ == "__main__":
    key = jax.random.PRNGKey(0)

    net_params = dict(
        in_dim=48, hidden_dim=32, out_dim=32, n_classes=8,
        in_feat_dropout=0.0, dropout=0.0, L=2,
        graph_norm=True, batch_norm=True, residual=True,
        device='tpu', builtin=False,
    )
    N = 256  # number of nodes (small demo)

    key, kg, kh = jax.random.split(key, 3)

    # random undirected graph with self-loops; mean aggregation = (1/deg) * (A @ h)
    A = (jax.random.uniform(kg, (N, N)) < 0.05).astype(jnp.float32)
    A = jnp.maximum(A, A.T)
    A = A.at[jnp.arange(N), jnp.arange(N)].set(1.0)
    deg = A.sum(axis=1, keepdims=True)
    adj_norm = A / deg

    h0 = jax.random.normal(kh, (N, net_params['in_dim']), jnp.float32)
    snorm_n = jnp.full((N, 1), 1.0 / math.sqrt(N), jnp.float32)

    params_raw = build_gcn_params(key, net_params)
    layers = [fold_and_pad_layer(p, net_params['batch_norm']) for p in params_raw]

    ref = gcn_ref(adj_norm, h0, snorm_n, params_raw, net_params)

    # small-graph fused path (one pallas_call / one grid step per layer)
    out_fused = jax.block_until_ready(
        gcn_net_forward(A, h0, snorm_n, layers, net_params))
    assert out_fused.shape == (N, net_params['n_classes'])
    err_f = jnp.linalg.norm(out_fused - ref) / (jnp.linalg.norm(ref) + 1e-6)
    assert float(err_f) < 5e-2, f"fused-path relative error too large: {float(err_f)}"

    # large-graph tiled path (bf16 transform + K-tiled int8-mask aggregation), forced here
    out_tiled = jax.block_until_ready(
        gcn_net_forward(A, h0, snorm_n, layers, net_params, force_tiled=True))
    assert out_tiled.shape == (N, net_params['n_classes'])
    err_t = jnp.linalg.norm(out_tiled - ref) / (jnp.linalg.norm(ref) + 1e-6)
    assert float(err_t) < 5e-2, f"tiled-path relative error too large: {float(err_t)}"

    print("KERNEL_OK")
</pallas_src>

<mosaic_0001>
module attributes {stable_mosaic.version = 11 : i64} {
  func.func @_fused_kernel(%arg0: i32, %arg1: memref<256x256xi8, #tpu.memory_space<vmem>>, %arg2: memref<256x128xbf16, #tpu.memory_space<vmem>>, %arg3: memref<128x128xbf16, #tpu.memory_space<vmem>>, %arg4: memref<1x128xf32, #tpu.memory_space<vmem>>, %arg5: memref<1x128xf32, #tpu.memory_space<vmem>>, %arg6: memref<256x1xf32, #tpu.memory_space<vmem>>, %arg7: memref<256x1xf32, #tpu.memory_space<vmem>>, %arg8: memref<256x128xbf16, #tpu.memory_space<vmem>>) attributes {dimension_semantics = [#tpu.dimension_semantics<arbitrary>], iteration_bounds = array<i64: 1>, scalar_prefetch = 0 : i64, scratch_operands = 0 : i64, tpu.core_type = #tpu.core_type<tc>, window_params = [{pipeline_mode = #tpu.pipeline_mode<synchronous>, transform_indices = @transform_0, window_bounds = array<i64: 256, 256>}, {pipeline_mode = #tpu.pipeline_mode<synchronous>, transform_indices = @transform_1, window_bounds = array<i64: 256, 128>}, {pipeline_mode = #tpu.pipeline_mode<synchronous>, transform_indices = @transform_2, window_bounds = array<i64: 128, 128>}, {pipeline_mode = #tpu.pipeline_mode<synchronous>, transform_indices = @transform_3, window_bounds = array<i64: 1, 128>}, {pipeline_mode = #tpu.pipeline_mode<synchronous>, transform_indices = @transform_4, window_bounds = array<i64: 1, 128>}, {pipeline_mode = #tpu.pipeline_mode<synchronous>, transform_indices = @transform_5, window_bounds = array<i64: 256, 1>}, {pipeline_mode = #tpu.pipeline_mode<synchronous>, transform_indices = @transform_6, window_bounds = array<i64: 256, 1>}, {pipeline_mode = #tpu.pipeline_mode<synchronous>, transform_indices = @transform_7, window_bounds = array<i64: 256, 128>}]} {
    %c0 = arith.constant 0 : index
    %c0_0 = arith.constant 0 : index
    %0 = vector.load %arg2[%c0, %c0_0] : memref<256x128xbf16, #tpu.memory_space<vmem>>, vector<256x128xbf16>
    %c0_1 = arith.constant 0 : index
    %c0_2 = arith.constant 0 : index
    %1 = vector.load %arg3[%c0_1, %c0_2] : memref<128x128xbf16, #tpu.memory_space<vmem>>, vector<128x128xbf16>
    %cst = arith.constant dense<0.000000e+00> : vector<256x128xf32>
    %2 = tpu.matmul %0, %1, %cst {dimension_numbers = #tpu.dot_dimension_numbers<[1], [0], [0], [1], [0, 0, 1, 1], [], []>} : vector<256x128xbf16>, vector<128x128xbf16>, vector<256x128xf32> -> vector<256x128xf32>
    %3 = arith.truncf %2 : vector<256x128xf32> to vector<256x128xbf16>
    %c0_3 = arith.constant 0 : index
    %c0_4 = arith.constant 0 : index
    %4 = vector.load %arg1[%c0_3, %c0_4] : memref<256x256xi8, #tpu.memory_space<vmem>>, vector<256x256xi8>
    %5 = arith.sitofp %4 : vector<256x256xi8> to vector<256x256xf32>
    %6 = arith.truncf %5 : vector<256x256xf32> to vector<256x256xbf16>
    %cst_5 = arith.constant dense<0.000000e+00> : vector<256x128xf32>
    %7 = tpu.matmul %6, %3, %cst_5 {dimension_numbers = #tpu.dot_dimension_numbers<[1], [0], [0], [1], [0, 0, 1, 1], [], []>} : vector<256x256xbf16>, vector<256x128xbf16>, vector<256x128xf32> -> vector<256x128xf32>
    %c0_6 = arith.constant 0 : index
    %c0_7 = arith.constant 0 : index
    %8 = vector.load %arg6[%c0_6, %c0_7] : memref<256x1xf32, #tpu.memory_space<vmem>>, vector<256x1xf32>
    %9 = vector.broadcast %8 : vector<256x1xf32> to vector<256x128xf32>
    %10 = arith.mulf %7, %9 : vector<256x128xf32>
    %c0_8 = arith.constant 0 : index
    %c0_9 = arith.constant 0 : index
    %11 = vector.load %arg4[%c0_8, %c0_9] : memref<1x128xf32, #tpu.memory_space<vmem>>, vector<1x128xf32>
    %12 = vector.broadcast %11 : vector<1x128xf32> to vector<256x128xf32>
    %13 = arith.addf %10, %12 : vector<256x128xf32>
    %c0_10 = arith.constant 0 : index
    %c0_11 = arith.constant 0 : index
    %14 = vector.load %arg7[%c0_10, %c0_11] : memref<256x1xf32, #tpu.memory_space<vmem>>, vector<256x1xf32>
    %15 = vector.broadcast %14 : vector<256x1xf32> to vector<256x128xf32>
    %16 = arith.mulf %13, %15 : vector<256x128xf32>
    %c0_12 = arith.constant 0 : index
    %c0_13 = arith.constant 0 : index
    %17 = vector.load %arg5[%c0_12, %c0_13] : memref<1x128xf32, #tpu.memory_space<vmem>>, vector<1x128xf32>
    %18 = vector.broadcast %17 : vector<1x128xf32> to vector<256x128xf32>
    %19 = arith.addf %16, %18 : vector<256x128xf32>
    %cst_14 = arith.constant 0.000000e+00 : f32
    %20 = vector.broadcast %cst_14 : f32 to vector<256x128xf32>
    %21 = arith.maximumf %19, %20 : vector<256x128xf32>
    %22 = arith.truncf %21 : vector<256x128xf32> to vector<256x128xbf16>
    %c0_15 = arith.constant 0 : index
    %c0_16 = arith.constant 0 : index
    %23 = vector.load %arg8[%c0_15, %c0_16] : memref<256x128xbf16, #tpu.memory_space<vmem>>, vector<256x128xbf16>
    tpu.vector_store %arg8[%c0_15, %c0_16], %22 {strides = array<i32>} : memref<256x128xbf16, #tpu.memory_space<vmem>>, vector<256x128xbf16>,
    return
  }
  func.func @transform_0(%arg0: i32) -> (i32, i32) {
    %c0_i32 = arith.constant 0 : i32
    %c0_i32_0 = arith.constant 0 : i32
    %c0_i32_1 = arith.constant 0 : i32
    return %c0_i32, %c0_i32_0 : i32, i32
  }
  func.func @transform_1(%arg0: i32) -> (i32, i32) {
    %c0_i32 = arith.constant 0 : i32
    %c0_i32_0 = arith.constant 0 : i32
    %c0_i32_1 = arith.constant 0 : i32
    return %c0_i32, %c0_i32_0 : i32, i32
  }
  func.func @transform_2(%arg0: i32) -> (i32, i32) {
    %c0_i32 = arith.constant 0 : i32
    %c0_i32_0 = arith.constant 0 : i32
    %c0_i32_1 = arith.constant 0 : i32
    return %c0_i32, %c0_i32_0 : i32, i32
  }
  func.func @transform_3(%arg0: i32) -> (i32, i32) {
    %c0_i32 = arith.constant 0 : i32
    %c0_i32_0 = arith.constant 0 : i32
    %c0_i32_1 = arith.constant 0 : i32
    return %c0_i32, %c0_i32_0 : i32, i32
  }
  func.func @transform_4(%arg0: i32) -> (i32, i32) {
    %c0_i32 = arith.constant 0 : i32
    %c0_i32_0 = arith.constant 0 : i32
    %c0_i32_1 = arith.constant 0 : i32
    return %c0_i32, %c0_i32_0 : i32, i32
  }
  func.func @transform_5(%arg0: i32) -> (i32, i32) {
    %c0_i32 = arith.constant 0 : i32
    %c0_i32_0 = arith.constant 0 : i32
    %c0_i32_1 = arith.constant 0 : i32
    return %c0_i32, %c0_i32_0 : i32, i32
  }
  func.func @transform_6(%arg0: i32) -> (i32, i32) {
    %c0_i32 = arith.constant 0 : i32
    %c0_i32_0 = arith.constant 0 : i32
    %c0_i32_1 = arith.constant 0 : i32
    return %c0_i32, %c0_i32_0 : i32, i32
  }
  func.func @transform_7(%arg0: i32) -> (i32, i32) {
    %c0_i32 = arith.constant 0 : i32
    %c0_i32_0 = arith.constant 0 : i32
    %c0_i32_1 = arith.constant 0 : i32
    return %c0_i32, %c0_i32_0 : i32, i32
  }
}

</mosaic_0001>

<bundles_post_ra>
// kernel: tpu_custom_call.1
= control target key start
LH: loop header
LB: loop body
LE: loop exit
PB: predicated region body
PF: predicated region fallthrough
CT: control target
= control target key end

     0   :  { %s2331_s0 = inlined_call_operand.vmem [shape: s8[256,256], index: 0, kind: input, shape index: {}]   ;;  %s2332_s1 = inlined_call_operand.vmem [shape: bf16[256,128], index: 1, kind: input, shape index: {}]   ;;  %s2333_s2 = inlined_call_operand.vmem [shape: bf16[128,128], index: 2, kind: input, shape index: {}]   ;;  %s2334_s3 = inlined_call_operand.vmem [shape: f32[1,128], index: 3, kind: input, shape index: {}]   ;;  %s2335_s4 = inlined_call_operand.vmem [shape: f32[1,128], index: 4, kind: input, shape index: {}]   ;;  %s2336_s5 = inlined_call_operand.vmem [shape: f32[256,1], index: 5, kind: input, shape index: {}]   ;;  %s2337_s6 = inlined_call_operand.vmem [shape: f32[256,1], index: 6, kind: input, shape index: {}]   ;;  %s2338_s7 = inlined_call_operand.hbm [shape: bf16[256,128], index: 7, kind: output, shape index: {}]  }
   0x1   :  { %v1731_v0 = vld [vmem:[%s2333_s2] sm:$0xff]   ;;  %v1732_v1 = vld [vmem:[%s2333_s2 + $0x8] sm:$0xff]   ;;  %v1733_v2 = vld [vmem:[%s2333_s2 + $0x10] sm:$0xff]  }
   0x2   :  { %1661 = vmatprep.subr.bf16.mxu0 %v1731_v0  ;;  %v1734_v3 = vld [vmem:[%s2333_s2 + $0x18] sm:$0xff]   ;;  %v1739_v4 = vld [vmem:[%s2332_s1] sm:$0xff]   ;;  %v1736_v6 = vld [vmem:[%s2333_s2 + $0x28] sm:$0xff]  }
   0x3   :  { %1662 = vmatpush3.bf16.msra.mxu0 %v1731_v0  ;;  %1677 = vmatprep.mubr.bf16.mxu0 %v1739_v4  ;;  %v1735_v5 = vld [vmem:[%s2333_s2 + $0x20] sm:$0xff]   ;;  %v1737_v7 = vld [vmem:[%s2333_s2 + $0x30] sm:$0xff]   ;;  %v1738_v8 = vld [vmem:[%s2333_s2 + $0x38] sm:$0xff]  }
   0x4   :  { %1663 = vmatprep.subr.bf16.mxu0 %v1732_v1 }
   0x7   :  { %1664 = vmatpush3.bf16.msra.mxu0 %v1732_v1 }
   0x8   :  { %1665 = vmatprep.subr.bf16.mxu0 %v1733_v2 }
   0xb   :  { %1666 = vmatpush3.bf16.msra.mxu0 %v1733_v2 }
   0xc   :  { %1667 = vmatprep.subr.bf16.mxu0 %v1734_v3 }
   0xf   :  { %1668 = vmatpush3.bf16.msra.mxu0 %v1734_v3 }
  0x10   :  { %1669 = vmatprep.subr.bf16.mxu0 %v1735_v5 }
  0x13   :  { %1670 = vmatpush3.bf16.msra.mxu0 %v1735_v5 }
  0x14   :  { %1671 = vmatprep.subr.bf16.mxu0 %v1736_v6 }
  0x17   :  { %1672 = vmatpush3.bf16.msra.mxu0 %v1736_v6 }
  0x18   :  { %1673 = vmatprep.subr.bf16.mxu0 %v1737_v7 }
  0x19   :  { %12 = vsyncpa [#allocation3], 0  ;;  %v1740_v9 = vld [vmem:[%s2332_s1 + $0x8] sm:$0xff]   ;;  %v1741_v10 = vld [vmem:[%s2332_s1 + $0x10] sm:$0xff]   ;;  %v1779_v24 = vmov 0  }
  0x1a   :  { %v1742_v11 = vld [vmem:[%s2332_s1 + $0x18] sm:$0xff]   ;;  %v1743_v12 = vld [vmem:[%s2332_s1 + $0x20] sm:$0xff]   ;;  %v1744_v13 = vld [vmem:[%s2332_s1 + $0x28] sm:$0xff]   ;;  %1730 = vset.pattern.permute.xlu1 %v1779_v24  ;;  %1729 = vset.pattern.permute.xlu0 %v1779_v24 }
  0x1b   :  { %1674 = vmatpush3.bf16.msra.mxu0 %v1737_v7  ;;  %v1745_v14 = vld [vmem:[%s2332_s1 + $0x30] sm:$0xff]   ;;  %v1746_v15 = vld [vmem:[%s2332_s1 + $0x38] sm:$0xff]   ;;  %v1747_v16 = vld [vmem:[%s2332_s1 + $0x40] sm:$0xff]  }
  0x1c   :  { %1675 = vmatprep.subr.bf16.mxu0 %v1738_v8  ;;  %v1748_v17 = vld [vmem:[%s2332_s1 + $0x48] sm:$0xff]   ;;  %v1749_v18 = vld [vmem:[%s2332_s1 + $0x50] sm:$0xff]   ;;  %v1750_v19 = vld [vmem:[%s2332_s1 + $0x58] sm:$0xff]  }
  0x1d   :  { %v1751_v20 = vld [vmem:[%s2332_s1 + $0x60] sm:$0xff]   ;;  %v1752_v21 = vld [vmem:[%s2332_s1 + $0x68] sm:$0xff]   ;;  %v1753_v22 = vld [vmem:[%s2332_s1 + $0x70] sm:$0xff]  }
  0x1e   :  { %v1754_v23 = vld [vmem:[%s2332_s1 + $0x78] sm:$0xff]   ;;  %v608_v25 = vld [vmem:[%s2336_s5 + $0x10] sm:$0xff]  ;;  %v606_v26 = vld [vmem:[%s2336_s5] sm:$0xff] }
  0x1f   :  { %1676 = vmatpush3.bf16.msra.mxu0 %v1738_v8  ;;  %650 = vperm.xlu1 %1730, %v608_v25   ;;  %v609_v27 = vld [vmem:[%s2336_s5 + $0x18] sm:$0xff]  ;;  %v607_v28 = vld [vmem:[%s2336_s5 + $0x8] sm:$0xff]  ;;  %v610_v30 = vld [vmem:[%s2336_s5 + $0x20] sm:$0xff] }
  0x20   :  { %640 = vperm.xlu0 %1729, %v606_v26   ;;  %v611_v29 = vld [vmem:[%s2336_s5 + $0x28] sm:$0xff]  ;;  %v613_v31 = vld [vmem:[%s2336_s5 + $0x38] sm:$0xff]  ;;  %v612_v32 = vld [vmem:[%s2336_s5 + $0x30] sm:$0xff] }
  0x21   :  { %v615_v33 = vld [vmem:[%s2336_s5 + $0x48] sm:$0xff]  ;;  %v614_v34 = vld [vmem:[%s2336_s5 + $0x40] sm:$0xff]  ;;  %v617_v35 = vld [vmem:[%s2336_s5 + $0x58] sm:$0xff] }
  0x22   :  { %1678 = vmatmul.mubr.bf16.vlgmr.msra.gmra.mrb[0].mxu0 %v1740_v9  ;;  %v616_v36 = vld [vmem:[%s2336_s5 + $0x50] sm:$0xff]  ;;  %v619_v37 = vld [vmem:[%s2336_s5 + $0x68] sm:$0xff]  ;;  %v618_v38 = vld [vmem:[%s2336_s5 + $0x60] sm:$0xff] }
  0x23   :  { %1681 = vmatprep.mubr.bf16.mxu0 %v1741_v10  ;;  %655 = vperm.xlu1 %1730, %v609_v27   ;;  %v621_v39 = vld [vmem:[%s2336_s5 + $0x78] sm:$0xff]  ;;  %v620_v40 = vld [vmem:[%s2336_s5 + $0x70] sm:$0xff]  ;;  %v623_v41 = vld [vmem:[%s2336_s5 + $0x88] sm:$0xff] }
  0x24   :  { %645 = vperm.xlu0 %1729, %v607_v28   ;;  %v622_v42 = vld [vmem:[%s2336_s5 + $0x80] sm:$0xff]  ;;  %v625_v43 = vld [vmem:[%s2336_s5 + $0x98] sm:$0xff]  ;;  %v624_v44 = vld [vmem:[%s2336_s5 + $0x90] sm:$0xff] }
  0x25   :  { %v627_v45 = vld [vmem:[%s2336_s5 + $0xa8] sm:$0xff]  ;;  %v626_v46 = vld [vmem:[%s2336_s5 + $0xa0] sm:$0xff]  ;;  %v629_v47 = vld [vmem:[%s2336_s5 + $0xb8] sm:$0xff] }
  0x26   :  { %v628_v48 = vld [vmem:[%s2336_s5 + $0xb0] sm:$0xff]  ;;  %v631_v49 = vld [vmem:[%s2336_s5 + $0xc8] sm:$0xff]  ;;  %v630_v50 = vld [vmem:[%s2336_s5 + $0xc0] sm:$0xff] }
  0x27   :  { %665 = vperm.xlu1 %1730, %v611_v29   ;;  %v633_v51 = vld [vmem:[%s2336_s5 + $0xd8] sm:$0xff]  ;;  %v632_v52 = vld [vmem:[%s2336_s5 + $0xd0] sm:$0xff]  ;;  %v635_v53 = vld [vmem:[%s2336_s5 + $0xe8] sm:$0xff] }
  0x28   :  { %660 = vperm.xlu0 %1729, %v610_v30   ;;  %v634_v54 = vld [vmem:[%s2336_s5 + $0xe0] sm:$0xff]  ;;  %v637_v55 = vld [vmem:[%s2336_s5 + $0xf8] sm:$0xff]  ;;  %v636_v56 = vld [vmem:[%s2336_s5 + $0xf0] sm:$0xff] }
  0x29   :  { %v870_v57 = vld [vmem:[%s2337_s6 + $0x8] sm:$0xff]  ;;  %v869_v58 = vld [vmem:[%s2337_s6] sm:$0xff]  ;;  %v872_v63 = vld [vmem:[%s2337_s6 + $0x18] sm:$0xff] }
  0x2a   :  { %1682 = vmatmul.mubr.bf16.gmra.mrb[4].mxu0 %v1742_v11  ;;  %v2000_v59 = vld [vmem:[%s2331_s0 + $0x8] sm:$0xff]  ;;  %v871_v0 = vld [vmem:[%s2337_s6 + $0x10] sm:$0xff]  ;;  %v873_v2 = vld [vmem:[%s2337_s6 + $0x20] sm:$0xff] }
  0x2b   :  { %1685 = vmatprep.mubr.bf16.mxu0 %v1743_v12  ;;  %675 = vperm.xlu1 %1730, %v613_v31   ;;  %v2005_v60 = vld [vmem:[%s2331_s0 + $0x28] sm:$0xff]  ;;  %v414_v61 = vunpack.c.l.s8.bf16 %v2000_v59  ;;  %v876_v3 = vld [vmem:[%s2337_s6 + $0x38] sm:$0xff]  ;;  %v875_v4 = vld [vmem:[%s2337_s6 + $0x30] sm:$0xff] }
  0x2c   :  { %670 = vperm.xlu0 %1729, %v612_v32   ;;  %v422_v62 = vunpack.c.l.s8.bf16 %v2005_v60  ;;  %v874_v1 = vld [vmem:[%s2337_s6 + $0x28] sm:$0xff]  ;;  %v877_v6 = vld [vmem:[%s2337_s6 + $0x40] sm:$0xff]  ;;  %v880_v7 = vld [vmem:[%s2337_s6 + $0x58] sm:$0xff] }
  0x2d   :  { %v878_v5 = vld [vmem:[%s2337_s6 + $0x48] sm:$0xff]  ;;  %v879_v8 = vld [vmem:[%s2337_s6 + $0x50] sm:$0xff]  ;;  %v881_v10 = vld [vmem:[%s2337_s6 + $0x60] sm:$0xff] }
  0x2e   :  { %509 = vmatprep.mubr.bf16.mxu1 %v422_v62  ;;  %v882_v9 = vld [vmem:[%s2337_s6 + $0x68] sm:$0xff]  ;;  %v884_v11 = vld [vmem:[%s2337_s6 + $0x78] sm:$0xff]  ;;  %v883_v12 = vld [vmem:[%s2337_s6 + $0x70] sm:$0xff] }
  0x2f   :  { %685 = vperm.xlu1 %1730, %v615_v33   ;;  %v895_v24 = vld [vmem:[%s2337_s6 + $0xd0] sm:$0xff]  ;;  %v898_v25 = vld [vmem:[%s2337_s6 + $0xe8] sm:$0xff]  ;;  %v897_v26 = vld [vmem:[%s2337_s6 + $0xe0] sm:$0xff] }
  0x30   :  { %680 = vperm.xlu0 %1729, %v614_v34   ;;  %v900_v27 = vld [vmem:[%s2337_s6 + $0xf8] sm:$0xff]  ;;  %v899_v28 = vld [vmem:[%s2337_s6 + $0xf0] sm:$0xff] }
  0x32   :  { %1686 = vmatmul.mubr.bf16.gmra.mrb[8].mxu0 %v1744_v13  ;;  %v886_v13 = vld [vmem:[%s2337_s6 + $0x88] sm:$0xff] }
  0x33   :  { %1689 = vmatprep.mubr.bf16.mxu0 %v1745_v14  ;;  %695 = vperm.xlu1 %1730, %v617_v35   ;;  %v885_v14 = vld [vmem:[%s2337_s6 + $0x80] sm:$0xff] }
  0x34   :  { %690 = vperm.xlu0 %1729, %v616_v36  }
  0x37   :  { %705 = vperm.xlu1 %1730, %v619_v37  }
  0x38   :  { %700 = vperm.xlu0 %1729, %v618_v38  }
  0x3a   :  { %1690 = vmatmul.mubr.bf16.gmra.mrb[12].mxu0 %v1746_v15  ;;  %v888_v15 = vld [vmem:[%s2337_s6 + $0x98] sm:$0xff] }
  0x3b   :  { %1693 = vmatprep.mubr.bf16.mxu0 %v1747_v16  ;;  %715 = vperm.xlu1 %1730, %v621_v39   ;;  %v887_v16 = vld [vmem:[%s2337_s6 + $0x90] sm:$0xff] }
  0x3c   :  { %710 = vperm.xlu0 %1729, %v620_v40  }
  0x3f   :  { %725 = vperm.xlu1 %1730, %v623_v41  }
  0x40   :  { %720 = vperm.xlu0 %1729, %v622_v42  }
  0x42   :  { %1694 = vmatmul.mubr.bf16.gmra.mrb[16].mxu0 %v1748_v17  ;;  %v890_v17 = vld [vmem:[%s2337_s6 + $0xa8] sm:$0xff] }
  0x43   :  { %1697 = vmatprep.mubr.bf16.mxu0 %v1749_v18  ;;  %735 = vperm.xlu1 %1730, %v625_v43   ;;  %v889_v18 = vld [vmem:[%s2337_s6 + $0xa0] sm:$0xff] }
  0x44   :  { %730 = vperm.xlu0 %1729, %v624_v44  }
  0x47   :  { %745 = vperm.xlu1 %1730, %v627_v45  }
  0x48   :  { %740 = vperm.xlu0 %1729, %v626_v46  }
  0x4a   :  { %1698 = vmatmul.mubr.bf16.gmra.mrb[20].mxu0 %v1750_v19  ;;  %v892_v19 = vld [vmem:[%s2337_s6 + $0xb8] sm:$0xff] }
  0x4b   :  { %1701 = vmatprep.mubr.bf16.mxu0 %v1751_v20  ;;  %755 = vperm.xlu1 %1730, %v629_v47   ;;  %v891_v20 = vld [vmem:[%s2337_s6 + $0xb0] sm:$0xff] }
  0x4c   :  { %750 = vperm.xlu0 %1729, %v628_v48  }
  0x4f   :  { %765 = vperm.xlu1 %1730, %v631_v49  }
  0x50   :  { %760 = vperm.xlu0 %1729, %v630_v50  }
  0x52   :  { %1702 = vmatmul.mubr.bf16.gmra.mrb[24].mxu0 %v1752_v21  ;;  %v894_v21 = vld [vmem:[%s2337_s6 + $0xc8] sm:$0xff] }
  0x53   :  { %1705 = vmatprep.mubr.bf16.mxu0 %v1753_v22  ;;  %775 = vperm.xlu1 %1730, %v633_v51   ;;  %v893_v22 = vld [vmem:[%s2337_s6 + $0xc0] sm:$0xff] }
  0x54   :  { %770 = vperm.xlu0 %1729, %v632_v52  }
  0x57   :  { %785 = vperm.xlu1 %1730, %v635_v53  }
  0x58   :  { %780 = vperm.xlu0 %1729, %v634_v54  }
  0x5a   :  { %1706 = vmatmul.mubr.bf16.gmra.mrb[28].mxu0 %v1754_v23  ;;  %v896_v23 = vld [vmem:[%s2337_s6 + $0xd8] sm:$0xff] }
  0x5b   :  { %795 = vperm.xlu1 %1730, %v637_v55   ;;  %477 = vmatprep.mubr.bf16.mxu0 %v414_v61 }
  0x5c   :  { %790 = vperm.xlu0 %1729, %v636_v56  }
  0x5f   :  { %908 = vperm.xlu1 %1730, %v870_v57  }
  0x60   :  { %903 = vperm.xlu0 %1729, %v869_v58  }
  0x63   :  { %918 = vperm.xlu1 %1730, %v872_v63  }
  0x64   :  { %913 = vperm.xlu0 %1729, %v871_v0  }
  0x67   :  { %928 = vperm.xlu1 %1730, %v874_v1  }
  0x68   :  { %923 = vperm.xlu0 %1729, %v873_v2  }
  0x6b   :  { %938 = vperm.xlu1 %1730, %v876_v3  }
  0x6c   :  { %933 = vperm.xlu0 %1729, %v875_v4  }
  0x6f   :  { %948 = vperm.xlu1 %1730, %v878_v5  }
  0x70   :  { %943 = vperm.xlu0 %1729, %v877_v6  }
  0x73   :  { %958 = vperm.xlu1 %1730, %v880_v7  }
  0x74   :  { %953 = vperm.xlu0 %1729, %v879_v8  }
  0x77   :  { %968 = vperm.xlu1 %1730, %v882_v9  }
  0x78   :  { %963 = vperm.xlu0 %1729, %v881_v10  }
  0x7b   :  { %978 = vperm.xlu1 %1730, %v884_v11  }
  0x7c   :  { %973 = vperm.xlu0 %1729, %v883_v12  }
  0x7f   :  { %988 = vperm.xlu1 %1730, %v886_v13  }
  0x80   :  { %983 = vperm.xlu0 %1729, %v885_v14  }
  0x83   :  { %998 = vperm.xlu1 %1730, %v888_v15   ;;  %v397_v15 = vld [vmem:[%s2331_s0] sm:$0xff] }
  0x84   :  { %993 = vperm.xlu0 %1729, %v887_v16   ;;  %v401_v16 = vld [vmem:[%s2331_s0 + $0x20] sm:$0xff] }
  0x87   :  { %1008 = vperm.xlu1 %1730, %v890_v17   ;;  %v413_v17 = vunpack.c.l.s8.bf16 %v397_v15 }
  0x88   :  { %1003 = vperm.xlu0 %1729, %v889_v18   ;;  %v421_v18 = vunpack.c.l.s8.bf16 %v401_v16 }
  0x8b   :  { %1018 = vperm.xlu1 %1730, %v892_v19   ;;  %v424_v19 = vunpack.c.h.s8.bf16 %v2005_v60  ;;  %v403_v60 = vld [vmem:[%s2331_s0 + $0x30] sm:$0xff] }
  0x8c   :  { %1013 = vperm.xlu0 %1729, %v891_v20   ;;  %v416_v20 = vunpack.c.h.s8.bf16 %v2000_v59  ;;  %v399_v59 = vld [vmem:[%s2331_s0 + $0x10] sm:$0xff] }
  0x8f   :  { %1028 = vperm.xlu1 %1730, %v894_v21   ;;  %v400_v21 = vld [vmem:[%s2331_s0 + $0x18] sm:$0xff] }
  0x90   :  { %1023 = vperm.xlu0 %1729, %v893_v22   ;;  %v404_v22 = vld [vmem:[%s2331_s0 + $0x38] sm:$0xff] }
  0x93   :  { %1038 = vperm.xlu1 %1730, %v896_v23   ;;  %v415_v23 = vunpack.c.h.s8.bf16 %v397_v15 }
  0x94   :  { %1033 = vperm.xlu0 %1729, %v895_v24   ;;  %v423_v24 = vunpack.c.h.s8.bf16 %v401_v16 }
  0x97   :  { %1048 = vperm.xlu1 %1730, %v898_v25   ;;  %v418_v25 = vunpack.c.l.s8.bf16 %v400_v21 }
  0x98   :  { %1043 = vperm.xlu0 %1729, %v897_v26   ;;  %v426_v26 = vunpack.c.l.s8.bf16 %v404_v22 }
  0x9b   :  { %1058 = vperm.xlu1 %1730, %v900_v27   ;;  %v417_v27 = vunpack.c.l.s8.bf16 %v399_v59 }
  0x9c   :  { %1053 = vperm.xlu0 %1729, %v899_v28   ;;  %v425_v28 = vunpack.c.l.s8.bf16 %v403_v60 }
  0xf5   :  { %v1679_v29 = vpop.f32.mrb[0].mxu0 }
  0xf6   :  { %v254_v30 = vpop.f32.mrb[1].mxu0 }
  0xf7   :  { %v1680_v31 = vpop.f32.mrb[2].mxu0 }
  0xf8   :  { %v382_v32 = vpack.c.bf16 %v1680_v31, %v1679_v29  ;;  %v257_v33 = vpop.f32.mrb[3].mxu0  ;;  %v420_v29 = vunpack.c.h.s8.bf16 %v400_v21  ;;  %v406_v31 = vld [vmem:[%s2331_s0 + $0x48] sm:$0xff] }
  0xf9   :  { %v381_v34 = vpack.c.bf16 %v257_v33, %v254_v30  ;;  %v428_v30 = vunpack.c.h.s8.bf16 %v404_v22  ;;  %v427_v33 = vunpack.c.h.s8.bf16 %v403_v60 }
  0xfd   :  { %v1683_v35 = vpop.f32.mrb[4].mxu0 }
  0xfe   :  { %v270_v36 = vpop.f32.mrb[5].mxu0 }
  0xff   :  { %v1684_v37 = vpop.f32.mrb[6].mxu0 }
 0x100   :  { %v384_v38 = vpack.c.bf16 %v1684_v37, %v1683_v35  ;;  %v273_v39 = vpop.f32.mrb[7].mxu0  ;;  %v405_v35 = vld [vmem:[%s2331_s0 + $0x40] sm:$0xff]  ;;  %v432_v37 = vunpack.c.h.s8.bf16 %v406_v31 }
 0x101   :  { %v383_v40 = vpack.c.bf16 %v273_v39, %v270_v36  ;;  %v429_v36 = vunpack.c.l.s8.bf16 %v405_v35  ;;  %v431_v39 = vunpack.c.h.s8.bf16 %v405_v35 }
 0x105   :  { %v1687_v41 = vpop.f32.mrb[8].mxu0 }
 0x106   :  { %v286_v42 = vpop.f32.mrb[9].mxu0 }
 0x107   :  { %v1688_v43 = vpop.f32.mrb[10].mxu0 }
 0x108   :  { %v386_v44 = vpack.c.bf16 %v1688_v43, %v1687_v41  ;;  %v289_v45 = vpop.f32.mrb[11].mxu0  ;;  %v407_v41 = vld [vmem:[%s2331_s0 + $0x50] sm:$0xff] }
 0x109   :  { %v385_v46 = vpack.c.bf16 %v289_v45, %v286_v42  ;;  %v433_v42 = vunpack.c.l.s8.bf16 %v407_v41  ;;  %v435_v45 = vunpack.c.h.s8.bf16 %v407_v41  ;;  %v2214_v41 = vld [vmem:[%s2334_s3] ss:$0 sm:$0xff]  ;;  %s1780_s3 = smov [#allocation2]  }
 0x10d   :  { %v1691_v47 = vpop.f32.mrb[12].mxu0 }
 0x10e   :  { %v302_v48 = vpop.f32.mrb[13].mxu0 }
 0x10f   :  { %v1692_v49 = vpop.f32.mrb[14].mxu0 }
 0x110   :  { %v388_v50 = vpack.c.bf16 %v1692_v49, %v1691_v47  ;;  %v305_v51 = vpop.f32.mrb[15].mxu0  ;;  %v409_v47 = vld [vmem:[%s2331_s0 + $0x60] sm:$0xff] }
 0x111   :  { %v387_v52 = vpack.c.bf16 %v305_v51, %v302_v48  ;;  %v437_v48 = vunpack.c.l.s8.bf16 %v409_v47  ;;  %v439_v51 = vunpack.c.h.s8.bf16 %v409_v47 }
 0x115   :  { %v1695_v53 = vpop.f32.mrb[16].mxu0 }
 0x116   :  { %v318_v54 = vpop.f32.mrb[17].mxu0 }
 0x117   :  { %v1696_v55 = vpop.f32.mrb[18].mxu0 }
 0x118   :  { %v390_v56 = vpack.c.bf16 %v1696_v55, %v1695_v53  ;;  %v321_v57 = vpop.f32.mrb[19].mxu0  ;;  %v411_v53 = vld [vmem:[%s2331_s0 + $0x70] sm:$0xff] }
 0x119   :  { %v389_v58 = vpack.c.bf16 %v321_v57, %v318_v54  ;;  %v441_v54 = vunpack.c.l.s8.bf16 %v411_v53  ;;  %v2143_v57 = vpop.permute.xlu1 %650 }
 0x11b   :  { %1549 = vmatprep.subr.bf16.mxu0 %v389_v58  ;;  %1709 = vmatprep.subr.bf16.mxu1 %v389_v58  ;;  %v641_v58 = vpop.permute.xlu0 %640 }
 0x11c   :  { %1550 = vmatpush3.bf16.msra.mxu0 %v381_v34  ;;  %1717 = vmatpush3.bf16.msra.mxu1 %v381_v34  ;;  %v430_v34 = vunpack.c.l.s8.bf16 %v406_v31 }
 0x11d   :  { %v1699_v61 = vpop.f32.mrb[20].mxu0  ;;  %1551 = vmatprep.subr.bf16.mxu0 %v390_v56  ;;  %1710 = vmatprep.subr.bf16.mxu1 %v390_v56  ;;  %v443_v56 = vunpack.c.h.s8.bf16 %v411_v53 }
 0x11e   :  { %v334_v62 = vpop.f32.mrb[21].mxu0 }
 0x11f   :  { %v1700_v63 = vpop.f32.mrb[22].mxu0 }
 0x120   :  { %v392_v0 = vpack.c.bf16 %v1700_v63, %v1699_v61  ;;  %v337_v1 = vpop.f32.mrb[23].mxu0  ;;  %1552 = vmatpush3.bf16.msra.mxu0 %v382_v32  ;;  %1718 = vmatpush3.bf16.msra.mxu1 %v382_v32  ;;  %v419_v32 = vunpack.c.h.s8.bf16 %v399_v59  ;;  %v2145_v61 = vpop.permute.xlu1 %655 }
 0x121   :  { %v391_v2 = vpack.c.bf16 %v337_v1, %v334_v62  ;;  %v646_v62 = vpop.permute.xlu0 %645 }
 0x123   :  { %1553 = vmatprep.subr.bf16.mxu0 %v391_v2  ;;  %1711 = vmatprep.subr.bf16.mxu1 %v391_v2 }
 0x124   :  { %1554 = vmatpush3.bf16.msra.mxu0 %v383_v40  ;;  %1719 = vmatpush3.bf16.msra.mxu1 %v383_v40  ;;  %v2147_v63 = vpop.permute.xlu1 %665 }
 0x125   :  { %v1703_v3 = vpop.f32.mrb[24].mxu0  ;;  %1555 = vmatprep.subr.bf16.mxu0 %v392_v0  ;;  %1712 = vmatprep.subr.bf16.mxu1 %v392_v0  ;;  %v2149_v0 = vpop.permute.xlu0 %660 }
 0x126   :  { %v350_v4 = vpop.f32.mrb[25].mxu0 }
 0x127   :  { %v1704_v5 = vpop.f32.mrb[26].mxu0 }
 0x128   :  { %v394_v6 = vpack.c.bf16 %v1704_v5, %v1703_v3  ;;  %v353_v7 = vpop.f32.mrb[27].mxu0  ;;  %1556 = vmatpush3.bf16.msra.mxu0 %v384_v38  ;;  %1720 = vmatpush3.bf16.msra.mxu1 %v384_v38  ;;  %v408_v38 = vld [vmem:[%s2331_s0 + $0x58] sm:$0xff]  ;;  %v2151_v1 = vpop.permute.xlu1 %675 }
 0x129   :  { %v393_v8 = vpack.c.bf16 %v353_v7, %v350_v4  ;;  %v434_v40 = vunpack.c.l.s8.bf16 %v408_v38  ;;  %v436_v43 = vunpack.c.h.s8.bf16 %v408_v38  ;;  %v2153_v2 = vpop.permute.xlu0 %670 }
 0x12b   :  { %1557 = vmatprep.subr.bf16.mxu0 %v393_v8  ;;  %1713 = vmatprep.subr.bf16.mxu1 %v393_v8 }
 0x12c   :  { %1558 = vmatpush3.bf16.msra.mxu0 %v385_v46  ;;  %1721 = vmatpush3.bf16.msra.mxu1 %v385_v46  ;;  %v686_v3 = vpop.permute.xlu1 %685 }
 0x12d   :  { %v1707_v9 = vpop.f32.mrb[28].mxu0  ;;  %1559 = vmatprep.subr.bf16.mxu0 %v394_v6  ;;  %1714 = vmatprep.subr.bf16.mxu1 %v394_v6  ;;  %v681_v4 = vpop.permute.xlu0 %680 }
 0x12e   :  { %v366_v10 = vpop.f32.mrb[29].mxu0 }
 0x12f   :  { %v1708_v11 = vpop.f32.mrb[30].mxu0 }
 0x130   :  { %v396_v12 = vpack.c.bf16 %v1708_v11, %v1707_v9  ;;  %v369_v13 = vpop.f32.mrb[31].mxu0  ;;  %1560 = vmatpush3.bf16.msra.mxu0 %v386_v44  ;;  %1722 = vmatpush3.bf16.msra.mxu1 %v386_v44  ;;  %v410_v44 = vld [vmem:[%s2331_s0 + $0x68] sm:$0xff]  ;;  %v2155_v5 = vpop.permute.xlu1 %695 }
 0x131   :  { %v395_v14 = vpack.c.bf16 %v369_v13, %v366_v10  ;;  %v438_v46 = vunpack.c.l.s8.bf16 %v410_v44  ;;  %v440_v49 = vunpack.c.h.s8.bf16 %v410_v44  ;;  %v2157_v6 = vpop.permute.xlu0 %690 }
 0x133   :  { %1561 = vmatprep.subr.bf16.mxu0 %v395_v14  ;;  %1715 = vmatprep.subr.bf16.mxu1 %v395_v14 }
 0x134   :  { %1562 = vmatpush3.bf16.msra.mxu0 %v387_v52  ;;  %1723 = vmatpush3.bf16.msra.mxu1 %v387_v52  ;;  %v2159_v7 = vpop.permute.xlu1 %705 }
 0x135   :  { %1563 = vmatprep.subr.bf16.mxu0 %v396_v12  ;;  %1716 = vmatprep.subr.bf16.mxu1 %v396_v12  ;;  %v2161_v8 = vpop.permute.xlu0 %700 }
 0x138   :  { %1564 = vmatpush3.bf16.msra.mxu0 %v388_v50  ;;  %1724 = vmatpush3.bf16.msra.mxu1 %v388_v50  ;;  %v412_v50 = vld [vmem:[%s2331_s0 + $0x78] sm:$0xff]  ;;  %v2163_v9 = vpop.permute.xlu1 %715 }
 0x139   :  { %v442_v52 = vunpack.c.l.s8.bf16 %v412_v50  ;;  %v444_v55 = vunpack.c.h.s8.bf16 %v412_v50  ;;  %v2165_v10 = vpop.permute.xlu0 %710 }
 0x13b   :  { %478 = vmatmul.mubr.bf16.vlgmr.msra.gmra.mrb[32].mxu0 %v413_v17  ;;  %510 = vmatmul.mubr.bf16.vlgmr.msra.gmra.mrb[0].mxu1 %v421_v18 }
 0x13c   :  { %485 = vmatprep.mubr.bf16.mxu0 %v416_v20  ;;  %517 = vmatprep.mubr.bf16.mxu1 %v424_v19  ;;  %v2167_v11 = vpop.permute.xlu1 %725 }
 0x13d   :  { %v2169_v12 = vpop.permute.xlu0 %720 }
 0x140   :  { %v2171_v13 = vpop.permute.xlu1 %735 }
 0x141   :  { %v2173_v14 = vpop.permute.xlu0 %730 }
 0x143   :  { %486 = vmatmul.mubr.bf16.gmra.mrb[36].mxu0 %v415_v23  ;;  %518 = vmatmul.mubr.bf16.gmra.mrb[4].mxu1 %v423_v24 }
 0x144   :  { %493 = vmatprep.mubr.bf16.mxu0 %v418_v25  ;;  %525 = vmatprep.mubr.bf16.mxu1 %v426_v26  ;;  %v2175_v15 = vpop.permute.xlu1 %745 }
 0x145   :  { %v2177_v16 = vpop.permute.xlu0 %740 }
 0x148   :  { %v2179_v17 = vpop.permute.xlu1 %755 }
 0x149   :  { %v2181_v18 = vpop.permute.xlu0 %750 }
 0x14b   :  { %494 = vmatmul.mubr.bf16.gmra.mrb[40].mxu0 %v417_v27  ;;  %526 = vmatmul.mubr.bf16.gmra.mrb[8].mxu1 %v425_v28 }
 0x14c   :  { %501 = vmatprep.mubr.bf16.mxu0 %v420_v29  ;;  %533 = vmatprep.mubr.bf16.mxu1 %v428_v30  ;;  %v2183_v19 = vpop.permute.xlu1 %765 }
 0x14d   :  { %v2185_v20 = vpop.permute.xlu0 %760 }
 0x150   :  { %v2187_v21 = vpop.permute.xlu1 %775 }
 0x151   :  { %v2189_v22 = vpop.permute.xlu0 %770 }
 0x153   :  { %502 = vmatmul.mubr.bf16.gmra.mrb[44].mxu0 %v419_v32  ;;  %534 = vmatmul.mubr.bf16.gmra.mrb[12].mxu1 %v427_v33 }
 0x154   :  { %541 = vmatprep.mubr.bf16.mxu1 %v430_v34  ;;  %v2191_v23 = vpop.permute.xlu1 %785 }
 0x155   :  { %v2193_v24 = vpop.permute.xlu0 %780 }
 0x158   :  { %v2195_v25 = vpop.permute.xlu1 %795 }
 0x159   :  { %v2197_v26 = vpop.permute.xlu0 %790 }
 0x15b   :  { %542 = vmatmul.mubr.bf16.gmra.mrb[16].mxu1 %v429_v36 }
 0x15c   :  { %549 = vmatprep.mubr.bf16.mxu1 %v432_v37  ;;  %v909_v59 = vpop.permute.xlu1 %908 }
 0x15d   :  { %v904_v60 = vpop.permute.xlu0 %903 }
 0x160   :  { %v2199_v27 = vpop.permute.xlu1 %918 }
 0x161   :  { %v2201_v28 = vpop.permute.xlu0 %913 }
 0x163   :  { %550 = vmatmul.mubr.bf16.gmra.mrb[20].mxu1 %v431_v39 }
 0x164   :  { %557 = vmatprep.mubr.bf16.mxu1 %v434_v40  ;;  %v2203_v29 = vpop.permute.xlu1 %928 }
 0x165   :  { %v2205_v30 = vpop.permute.xlu0 %923 }
 0x168   :  { %v2207_v31 = vpop.permute.xlu1 %938 }
 0x169   :  { %v2209_v32 = vpop.permute.xlu0 %933 }
 0x16b   :  { %558 = vmatmul.mubr.bf16.gmra.mrb[24].mxu1 %v433_v42 }
 0x16c   :  { %565 = vmatprep.mubr.bf16.mxu1 %v436_v43 }
 0x16d   :  { %v944_v53 = vpop.permute.xlu0 %943 }
 0x173   :  { %566 = vmatmul.mubr.bf16.gmra.mrb[28].mxu1 %v435_v45 }
 0x174   :  { %573 = vmatprep.mubr.bf16.mxu1 %v438_v46 }
 0x17b   :  { %574 = vmatmul.mubr.bf16.gmra.mrb[32].mxu1 %v437_v48 }
 0x17c   :  { %581 = vmatprep.mubr.bf16.mxu1 %v440_v49 }
 0x183   :  { %582 = vmatmul.mubr.bf16.gmra.mrb[36].mxu1 %v439_v51 }
 0x184   :  { %589 = vmatprep.mubr.bf16.mxu1 %v442_v52  ;;  %v949_v52 = vpop.permute.xlu1 %948 }
 0x18b   :  { %590 = vmatmul.mubr.bf16.gmra.mrb[40].mxu1 %v441_v54  ;;  %v2221_v54 = vld [vmem:[%s2335_s4] ss:$0 sm:$0xff]  ;;  %s1329_s4 = sshll.u32 %s1780_s3, 4  ;;  %s1330_s4 = int_to_ptr.vmem [resolvable:$true] %s1329_s4 }
 0x18c   :  { %597 = vmatprep.mubr.bf16.mxu1 %v444_v55  ;;  %s1755_s1 = scalar_lea.vmem %s1330_s4, 2048  ;;  %p1760_p1 = scmp.lt.s32.totalorder %s1330_s4, %s1330_s4 }
 0x18d   :  { %p1756_p0 = scmp.ne.s32.totalorder %s1330_s4, %s1755_s1  ;;  %p1761_p2 = scmp.lt.s32.totalorder %s1755_s1, %s1755_s1 }
 0x18f   :  { %p1762_p3 = por %p1761_p2, %p1760_p1 }
 0x191   :  { %p1763_p4 = pnand %p1762_p3, %p1756_p0 }
 0x193   :  { %598 = vmatmul.mubr.bf16.gmra.mrb[44].mxu1 %v443_v56 }
 0x20e   :  { %v1565_v33 = vpop.f32.mrb[32].mxu0  ;;  %v1589_v34 = vpop.f32.mrb[0].mxu1 }
 0x20f   :  { %v1566_v35 = vpop.f32.mrb[33].mxu0  ;;  %v1590_v36 = vpop.f32.mrb[1].mxu1 }
 0x210   :  { %v1567_v37 = vadd.f32 %v1566_v35, %v1565_v33  ;;  %v1591_v38 = vadd.f32 %v1590_v36, %v1589_v34  ;;  %v1568_v39 = vpop.f32.mrb[34].mxu0  ;;  %v1592_v40 = vpop.f32.mrb[2].mxu1 }
 0x211   :  { %v1569_v42 = vpop.f32.mrb[35].mxu0  ;;  %v1593_v43 = vpop.f32.mrb[3].mxu1 }
 0x212   :  { %v798_v44 = vmul.f32 %v1567_v37, %v641_v58  ;;  %v806_v45 = vmul.f32 %v1591_v38, %v681_v4  ;;  %v1570_v46 = vadd.f32 %v1569_v42, %v1568_v39  ;;  %v1594_v47 = vadd.f32 %v1593_v43, %v1592_v40 }
 0x214   :  { %v837_v48 = vadd.f32 %v2214_v41, %v798_v44  ;;  %v845_v49 = vadd.f32 %v2214_v41, %v806_v45  ;;  %v799_v50 = vmul.f32 %v1570_v46, %v646_v62  ;;  %v807_v51 = vmul.f32 %v1594_v47, %v686_v3 }
 0x216   :  { %v1061_v55 = vmul.f32 %v904_v60, %v837_v48  ;;  %v1069_v56 = vmul.f32 %v944_v53, %v845_v49  ;;  %v838_v58 = vadd.f32 %v2214_v41, %v799_v50  ;;  %v846_v4 = vadd.f32 %v2214_v41, %v807_v51  ;;  %v1571_v33 = vpop.f32.mrb[36].mxu0  ;;  %v1595_v34 = vpop.f32.mrb[4].mxu1 }
 0x217   :  { %v1572_v35 = vpop.f32.mrb[37].mxu0  ;;  %v1596_v36 = vpop.f32.mrb[5].mxu1 }
 0x218   :  { %v1100_v62 = vadd.f32 %v2221_v54, %v1061_v55  ;;  %v1108_v3 = vadd.f32 %v2221_v54, %v1069_v56  ;;  %v1062_v37 = vmul.f32 %v909_v59, %v838_v58  ;;  %v1070_v38 = vmul.f32 %v949_v52, %v846_v4  ;;  %v1574_v39 = vpop.f32.mrb[38].mxu0  ;;  %v1598_v40 = vpop.f32.mrb[6].mxu1 }
 0x219   :  { %v1573_v42 = vadd.f32 %v1572_v35, %v1571_v33  ;;  %v1597_v43 = vadd.f32 %v1596_v36, %v1595_v34  ;;  %v1575_v60 = vpop.f32.mrb[39].mxu0  ;;  %v1599_v44 = vpop.f32.mrb[7].mxu1 }
 0x21a   :  { %v1101_v45 = vadd.f32 %v2221_v54, %v1062_v37  ;;  %v1109_v46 = vadd.f32 %v2221_v54, %v1070_v38  ;;  %v1576_v49 = vadd.f32 %v1575_v60, %v1574_v39  ;;  %v1600_v50 = vadd.f32 %v1599_v44, %v1598_v40  ;;  %v959_v55 = vpop.permute.xlu1 %958  ;;  %v954_v56 = vpop.permute.xlu0 %953 }
 0x21b   :  { %v800_v47 = vmul.f32 %v1573_v42, %v2143_v57  ;;  %v808_v48 = vmul.f32 %v1597_v43, %v2157_v6  ;;  %v1132_v51 = vmax.f32 %v1100_v62, 0.0  ;;  %v1140_v53 = vmax.f32 %v1108_v3, 0.0 }
 0x21c   :  { %v1133_v59 = vmax.f32 %v1101_v45, 0.0  ;;  %v1141_v52 = vmax.f32 %v1109_v46, 0.0  ;;  %v801_v33 = vmul.f32 %v1576_v49, %v2145_v61  ;;  %v809_v34 = vmul.f32 %v1600_v50, %v2155_v5 }
 0x21d   :  { %v839_v58 = vadd.f32 %v2214_v41, %v800_v47  ;;  %v847_v4 = vadd.f32 %v2214_v41, %v808_v48 }
 0x21e   :  { %v1433_v35 = vpack.c.bf16 %v1133_v59, %v1132_v51  ;;  %v1453_v57 = vpack.c.bf16 %v1141_v52, %v1140_v53  ;;  %v1577_v36 = vpop.f32.mrb[40].mxu0  ;;  %v1601_v6 = vpop.f32.mrb[8].mxu1  ;;  %v840_v3 = vadd.f32 %v2214_v41, %v801_v33  ;;  %v848_v38 = vadd.f32 %v2214_v41, %v809_v34 }
 0x21f   :  { %v1063_v37 = vmul.f32 %v2201_v28, %v839_v58  ;;  %v1071_v62 = vmul.f32 %v954_v56, %v847_v4  ;;  %v1578_v39 = vpop.f32.mrb[41].mxu0  ;;  %v1602_v40 = vpop.f32.mrb[9].mxu1 }
 0x220   :  { %1434 = vst [vmem:[#allocation2] sm:$0xff] %v1433_v35   ;;  %1513 = vst [vmem:[#allocation2 + $0x20] sm:$0xff] %v1453_v57   ;;  %v1579_v42 = vadd.f32 %v1578_v39, %v1577_v36  ;;  %v1603_v43 = vadd.f32 %v1602_v40, %v1601_v6  ;;  %v1580_v61 = vpop.f32.mrb[42].mxu0  ;;  %v1604_v60 = vpop.f32.mrb[10].mxu1  ;;  %v1064_v45 = vmul.f32 %v2199_v27, %v840_v3 }
 0x221   :  { %v1102_v5 = vadd.f32 %v2221_v54, %v1063_v37  ;;  %v1110_v44 = vadd.f32 %v2221_v54, %v1071_v62  ;;  %v1072_v28 = vmul.f32 %v959_v55, %v848_v38  ;;  %v1581_v46 = vpop.f32.mrb[43].mxu0  ;;  %v1605_v47 = vpop.f32.mrb[11].mxu1 }
 0x222   :  { %v802_v48 = vmul.f32 %v1579_v42, %v2149_v0  ;;  %v810_v49 = vmul.f32 %v1603_v43, %v2161_v8  ;;  %v1582_v50 = vadd.f32 %v1581_v46, %v1580_v61  ;;  %v1606_v51 = vadd.f32 %v1605_v47, %v1604_v60  ;;  %v969_v55 = vpop.permute.xlu1 %968  ;;  %v964_v4 = vpop.permute.xlu0 %963 }
 0x223   :  { %v1103_v53 = vadd.f32 %v2221_v54, %v1064_v45  ;;  %v1111_v59 = vadd.f32 %v2221_v54, %v1072_v28  ;;  %v1134_v33 = vmax.f32 %v1102_v5, 0.0  ;;  %v1142_v0 = vmax.f32 %v1110_v44, 0.0 }
 0x224   :  { %v841_v52 = vadd.f32 %v2214_v41, %v802_v48  ;;  %v849_v56 = vadd.f32 %v2214_v41, %v810_v49  ;;  %v803_v58 = vmul.f32 %v1582_v50, %v2147_v63  ;;  %v811_v27 = vmul.f32 %v1606_v51, %v2159_v7 }
 0x225   :  { %v1135_v34 = vmax.f32 %v1103_v53, 0.0  ;;  %v1143_v8 = vmax.f32 %v1111_v59, 0.0 }
 0x226   :  { %v1065_v35 = vmul.f32 %v2205_v30, %v841_v52  ;;  %v1073_v57 = vmul.f32 %v964_v4, %v849_v56  ;;  %v842_v36 = vadd.f32 %v2214_v41, %v803_v58  ;;  %v850_v6 = vadd.f32 %v2214_v41, %v811_v27  ;;  %v1583_v37 = vpop.f32.mrb[44].mxu0  ;;  %v1607_v62 = vpop.f32.mrb[12].mxu1 }
 0x227   :  { %v1438_v3 = vpack.c.bf16 %v1135_v34, %v1134_v33  ;;  %v1458_v38 = vpack.c.bf16 %v1143_v8, %v1142_v0  ;;  %v1584_v63 = vpop.f32.mrb[45].mxu0  ;;  %v1608_v39 = vpop.f32.mrb[13].mxu1 }
 0x228   :  { %v1104_v7 = vadd.f32 %v2221_v54, %v1065_v35  ;;  %v1112_v40 = vadd.f32 %v2221_v54, %v1073_v57  ;;  %v1066_v42 = vmul.f32 %v2203_v29, %v842_v36  ;;  %v1074_v43 = vmul.f32 %v969_v55, %v850_v6  ;;  %v1586_v61 = vpop.f32.mrb[46].mxu0  ;;  %v1610_v30 = vpop.f32.mrb[14].mxu1 }
 0x229   :  { %1510 = vst [vmem:[#allocation2 + $0x8] sm:$0xff] %v1438_v3   ;;  %1514 = vst [vmem:[#allocation2 + $0x28] sm:$0xff] %v1458_v38   ;;  %v1585_v60 = vadd.f32 %v1584_v63, %v1583_v37  ;;  %v1609_v5 = vadd.f32 %v1608_v39, %v1607_v62  ;;  %v1587_v44 = vpop.f32.mrb[47].mxu0  ;;  %v1611_v45 = vpop.f32.mrb[15].mxu1 }
 0x22a   :  { %v1105_v28 = vadd.f32 %v2221_v54, %v1066_v42  ;;  %v1113_v46 = vadd.f32 %v2221_v54, %v1074_v43  ;;  %v1588_v49 = vadd.f32 %v1587_v44, %v1586_v61  ;;  %v1612_v50 = vadd.f32 %v1611_v45, %v1610_v30  ;;  %v974_v55 = vpop.permute.xlu0 %973  ;;  %v979_v57 = vpop.permute.xlu1 %978 }
 0x22b   :  { %v804_v47 = vmul.f32 %v1585_v60, %v2153_v2  ;;  %v812_v48 = vmul.f32 %v1609_v5, %v2165_v10  ;;  %v1136_v29 = vmax.f32 %v1104_v7, 0.0  ;;  %v1144_v51 = vmax.f32 %v1112_v40, 0.0 }
 0x22c   :  { %v1137_v53 = vmax.f32 %v1105_v28, 0.0  ;;  %v1145_v59 = vmax.f32 %v1113_v46, 0.0  ;;  %v805_v58 = vmul.f32 %v1588_v49, %v2151_v1  ;;  %v813_v27 = vmul.f32 %v1612_v50, %v2163_v9 }
 0x22d   :  { %v843_v52 = vadd.f32 %v2214_v41, %v804_v47  ;;  %v851_v56 = vadd.f32 %v2214_v41, %v812_v48 }
 0x22e   :  { %v1443_v4 = vpack.c.bf16 %v1137_v53, %v1136_v29  ;;  %v1463_v33 = vpack.c.bf16 %v1145_v59, %v1144_v51  ;;  %v1613_v2 = vpop.f32.mrb[16].mxu1  ;;  %v844_v34 = vadd.f32 %v2214_v41, %v805_v58  ;;  %v852_v8 = vadd.f32 %v2214_v41, %v813_v27  ;;  %v984_v42 = vpop.permute.xlu0 %983 }
 0x22f   :  { %v1067_v10 = vmul.f32 %v2209_v32, %v843_v52  ;;  %v1075_v0 = vmul.f32 %v974_v55, %v851_v56  ;;  %v1614_v35 = vpop.f32.mrb[17].mxu1  ;;  %v989_v45 = vpop.permute.xlu1 %988 }
 0x230   :  { %1511 = vst [vmem:[#allocation2 + $0x10] sm:$0xff] %v1443_v4   ;;  %1515 = vst [vmem:[#allocation2 + $0x30] sm:$0xff] %v1463_v33   ;;  %v1615_v36 = vadd.f32 %v1614_v35, %v1613_v2  ;;  %v1616_v6 = vpop.f32.mrb[18].mxu1  ;;  %v1068_v37 = vmul.f32 %v2207_v31, %v844_v34  ;;  %v1076_v62 = vmul.f32 %v979_v57, %v852_v8 }
 0x231   :  { %v1106_v1 = vadd.f32 %v2221_v54, %v1067_v10  ;;  %v1114_v9 = vadd.f32 %v2221_v54, %v1075_v0  ;;  %v1617_v3 = vpop.f32.mrb[19].mxu1 }
 0x232   :  { %v814_v32 = vmul.f32 %v1615_v36, %v2169_v12  ;;  %v1618_v38 = vadd.f32 %v1617_v3, %v1616_v6  ;;  %v1107_v63 = vadd.f32 %v2221_v54, %v1068_v37  ;;  %v1115_v39 = vadd.f32 %v2221_v54, %v1076_v62  ;;  %v994_v27 = vpop.permute.xlu0 %993 }
 0x233   :  { %v1138_v43 = vmax.f32 %v1106_v1, 0.0  ;;  %v1146_v61 = vmax.f32 %v1114_v9, 0.0  ;;  %v999_v10 = vpop.permute.xlu1 %998 }
 0x234   :  { %v853_v7 = vadd.f32 %v2214_v41, %v814_v32  ;;  %v815_v40 = vmul.f32 %v1618_v38, %v2167_v11  ;;  %v1139_v30 = vmax.f32 %v1107_v63, 0.0  ;;  %v1147_v60 = vmax.f32 %v1115_v39, 0.0 }
 0x236   :  { %v1077_v5 = vmul.f32 %v984_v42, %v853_v7  ;;  %v854_v31 = vadd.f32 %v2214_v41, %v815_v40  ;;  %v1619_v44 = vpop.f32.mrb[20].mxu1  ;;  %v1448_v12 = vpack.c.bf16 %v1139_v30, %v1138_v43  ;;  %v1468_v28 = vpack.c.bf16 %v1147_v60, %v1146_v61  ;;  %v1004_v3 = vpop.permute.xlu0 %1003 }
 0x237   :  { %v1620_v46 = vpop.f32.mrb[21].mxu1  ;;  %v1009_v7 = vpop.permute.xlu1 %1008 }
 0x238   :  { %v1116_v47 = vadd.f32 %v2221_v54, %v1077_v5  ;;  %v1078_v48 = vmul.f32 %v989_v45, %v854_v31  ;;  %v1621_v49 = vadd.f32 %v1620_v46, %v1619_v44  ;;  %v1622_v50 = vpop.f32.mrb[22].mxu1  ;;  %1512 = vst [vmem:[#allocation2 + $0x18] sm:$0xff] %v1448_v12   ;;  %1516 = vst [vmem:[#allocation2 + $0x38] sm:$0xff] %v1468_v28  }
 0x239   :  { %v1623_v11 = vpop.f32.mrb[23].mxu1 }
 0x23a   :  { %v1117_v29 = vadd.f32 %v2221_v54, %v1078_v48  ;;  %v816_v51 = vmul.f32 %v1621_v49, %v2173_v14  ;;  %v1624_v53 = vadd.f32 %v1623_v11, %v1622_v50  ;;  %v1148_v59 = vmax.f32 %v1116_v47, 0.0  ;;  %v1014_v28 = vpop.permute.xlu0 %1013 }
 0x23b   :  { %v1019_v50 = vpop.permute.xlu1 %1018 }
 0x23c   :  { %v1149_v52 = vmax.f32 %v1117_v29, 0.0  ;;  %v855_v56 = vadd.f32 %v2214_v41, %v816_v51  ;;  %v817_v58 = vmul.f32 %v1624_v53, %v2171_v13 }
 0x23e   :  { %v1473_v55 = vpack.c.bf16 %v1149_v52, %v1148_v59  ;;  %v1079_v4 = vmul.f32 %v994_v27, %v855_v56  ;;  %v856_v33 = vadd.f32 %v2214_v41, %v817_v58  ;;  %v1625_v2 = vpop.f32.mrb[24].mxu1 }
 0x23f   :  { %v1626_v0 = vpop.f32.mrb[25].mxu1 }
 0x240   :  { %1517 = vst [vmem:[#allocation2 + $0x40] sm:$0xff] %v1473_v55   ;;  %v1118_v34 = vadd.f32 %v2221_v54, %v1079_v4  ;;  %v1080_v8 = vmul.f32 %v999_v10, %v856_v33  ;;  %v1627_v14 = vadd.f32 %v1626_v0, %v1625_v2  ;;  %v1628_v35 = vpop.f32.mrb[26].mxu1  ;;  %v1024_v33 = vpop.permute.xlu0 %1023 }
 0x241   :  { %v1629_v57 = vpop.f32.mrb[27].mxu1 }
 0x242   :  { %v1119_v36 = vadd.f32 %v2221_v54, %v1080_v8  ;;  %v818_v6 = vmul.f32 %v1627_v14, %v2177_v16  ;;  %v1630_v13 = vadd.f32 %v1629_v57, %v1628_v35  ;;  %v1150_v1 = vmax.f32 %v1118_v34, 0.0  ;;  %v1029_v8 = vpop.permute.xlu1 %1028 }
 0x244   :  { %v1151_v9 = vmax.f32 %v1119_v36, 0.0  ;;  %v857_v37 = vadd.f32 %v2214_v41, %v818_v6  ;;  %v819_v62 = vmul.f32 %v1630_v13, %v2175_v15 }
 0x246   :  { %v1478_v32 = vpack.c.bf16 %v1151_v9, %v1150_v1  ;;  %v1081_v38 = vmul.f32 %v1004_v3, %v857_v37  ;;  %v858_v63 = vadd.f32 %v2214_v41, %v819_v62  ;;  %v1631_v39 = vpop.f32.mrb[28].mxu1 }
 0x247   :  { %v1632_v40 = vpop.f32.mrb[29].mxu1 }
 0x248   :  { %1518 = vst [vmem:[#allocation2 + $0x48] sm:$0xff] %v1478_v32   ;;  %v1120_v42 = vadd.f32 %v2221_v54, %v1081_v38  ;;  %v1082_v43 = vmul.f32 %v1009_v7, %v858_v63  ;;  %v1633_v16 = vadd.f32 %v1632_v40, %v1631_v39  ;;  %v1634_v61 = vpop.f32.mrb[30].mxu1  ;;  %v1034_v32 = vpop.permute.xlu0 %1033 }
 0x249   :  { %v1635_v30 = vpop.f32.mrb[31].mxu1  ;;  %v1039_v40 = vpop.permute.xlu1 %1038 }
 0x24a   :  { %v1121_v60 = vadd.f32 %v2221_v54, %v1082_v43  ;;  %v820_v5 = vmul.f32 %v1633_v16, %v2181_v18  ;;  %v1636_v15 = vadd.f32 %v1635_v30, %v1634_v61  ;;  %v1152_v31 = vmax.f32 %v1120_v42, 0.0 }
 0x24c   :  { %v1153_v44 = vmax.f32 %v1121_v60, 0.0  ;;  %v859_v45 = vadd.f32 %v2214_v41, %v820_v5  ;;  %v821_v12 = vmul.f32 %v1636_v15, %v2179_v17 }
 0x24e   :  { %v1483_v46 = vpack.c.bf16 %v1153_v44, %v1152_v31  ;;  %v1083_v47 = vmul.f32 %v1014_v28, %v859_v45  ;;  %v860_v48 = vadd.f32 %v2214_v41, %v821_v12  ;;  %v1637_v49 = vpop.f32.mrb[32].mxu1  ;;  %v1044_v12 = vpop.permute.xlu0 %1043 }
 0x24f   :  { %v1638_v11 = vpop.f32.mrb[33].mxu1 }
 0x250   :  { %1519 = vst [vmem:[#allocation2 + $0x50] sm:$0xff] %v1483_v46   ;;  %v1122_v29 = vadd.f32 %v2221_v54, %v1083_v47  ;;  %v1084_v51 = vmul.f32 %v1019_v50, %v860_v48  ;;  %v1639_v18 = vadd.f32 %v1638_v11, %v1637_v49  ;;  %v1640_v53 = vpop.f32.mrb[34].mxu1  ;;  %v1049_v49 = vpop.permute.xlu1 %1048 }
 0x251   :  { %v1641_v59 = vpop.f32.mrb[35].mxu1 }
 0x252   :  { %v1123_v52 = vadd.f32 %v2221_v54, %v1084_v51  ;;  %v822_v56 = vmul.f32 %v1639_v18, %v2185_v20  ;;  %v1642_v17 = vadd.f32 %v1641_v59, %v1640_v53  ;;  %v1154_v58 = vmax.f32 %v1122_v29, 0.0 }
 0x254   :  { %v1155_v27 = vmax.f32 %v1123_v52, 0.0  ;;  %v861_v55 = vadd.f32 %v2214_v41, %v822_v56  ;;  %v823_v4 = vmul.f32 %v1642_v17, %v2183_v19 }
 0x256   :  { %v1488_v2 = vpack.c.bf16 %v1155_v27, %v1154_v58  ;;  %v1085_v10 = vmul.f32 %v1024_v33, %v861_v55  ;;  %v862_v0 = vadd.f32 %v2214_v41, %v823_v4  ;;  %v1643_v34 = vpop.f32.mrb[36].mxu1  ;;  %v1054_v27 = vpop.permute.xlu0 %1053 }
 0x257   :  { %v1644_v14 = vpop.f32.mrb[37].mxu1 }
 0x258   :  { %1520 = vst [vmem:[#allocation2 + $0x58] sm:$0xff] %v1488_v2   ;;  %v1124_v35 = vadd.f32 %v2221_v54, %v1085_v10  ;;  %v1086_v57 = vmul.f32 %v1029_v8, %v862_v0  ;;  %v1645_v20 = vadd.f32 %v1644_v14, %v1643_v34  ;;  %v1646_v36 = vpop.f32.mrb[38].mxu1  ;;  %v1059_v2 = vpop.permute.xlu1 %1058 }
 0x259   :  { %v1647_v6 = vpop.f32.mrb[39].mxu1 }
 0x25a   :  { %v1125_v13 = vadd.f32 %v2221_v54, %v1086_v57  ;;  %v824_v1 = vmul.f32 %v1645_v20, %v2189_v22  ;;  %v1648_v19 = vadd.f32 %v1647_v6, %v1646_v36  ;;  %v1156_v9 = vmax.f32 %v1124_v35, 0.0 }
 0x25c   :  { %v1157_v37 = vmax.f32 %v1125_v13, 0.0  ;;  %v863_v62 = vadd.f32 %v2214_v41, %v824_v1  ;;  %v825_v3 = vmul.f32 %v1648_v19, %v2187_v21 }
 0x25e   :  { %v1493_v38 = vpack.c.bf16 %v1157_v37, %v1156_v9  ;;  %v1087_v63 = vmul.f32 %v1034_v32, %v863_v62  ;;  %v864_v39 = vadd.f32 %v2214_v41, %v825_v3  ;;  %v1649_v7 = vpop.f32.mrb[40].mxu1 }
 0x25f   :  { %v1650_v42 = vpop.f32.mrb[41].mxu1 }
 0x260   :  { %1521 = vst [vmem:[#allocation2 + $0x60] sm:$0xff] %v1493_v38   ;;  %v1126_v43 = vadd.f32 %v2221_v54, %v1087_v63  ;;  %v1088_v16 = vmul.f32 %v1039_v40, %v864_v39  ;;  %v1651_v22 = vadd.f32 %v1650_v42, %v1649_v7  ;;  %v1652_v61 = vpop.f32.mrb[42].mxu1 }
 0x261   :  { %v1653_v30 = vpop.f32.mrb[43].mxu1 }
 0x262   :  { %v1127_v60 = vadd.f32 %v2221_v54, %v1088_v16  ;;  %v826_v5 = vmul.f32 %v1651_v22, %v2193_v24  ;;  %v1654_v21 = vadd.f32 %v1653_v30, %v1652_v61  ;;  %v1158_v15 = vmax.f32 %v1126_v43, 0.0 }
 0x264   :  { %v1159_v31 = vmax.f32 %v1127_v60, 0.0  ;;  %v865_v44 = vadd.f32 %v2214_v41, %v826_v5  ;;  %v827_v45 = vmul.f32 %v1654_v21, %v2191_v23 }
 0x266   :  { %v1498_v28 = vpack.c.bf16 %v1159_v31, %v1158_v15  ;;  %v1089_v46 = vmul.f32 %v1044_v12, %v865_v44  ;;  %v866_v47 = vadd.f32 %v2214_v41, %v827_v45  ;;  %v1655_v48 = vpop.f32.mrb[44].mxu1 }
 0x267   :  { %v1656_v50 = vpop.f32.mrb[45].mxu1 }
 0x268   :  { %1522 = vst [vmem:[#allocation2 + $0x68] sm:$0xff] %v1498_v28   ;;  %v1128_v11 = vadd.f32 %v2221_v54, %v1089_v46  ;;  %v1090_v29 = vmul.f32 %v1049_v49, %v866_v47  ;;  %v1657_v24 = vadd.f32 %v1656_v50, %v1655_v48  ;;  %v1658_v51 = vpop.f32.mrb[46].mxu1 }
 0x269   :  { %v1659_v18 = vpop.f32.mrb[47].mxu1 }
 0x26a   :  { %v1129_v53 = vadd.f32 %v2221_v54, %v1090_v29  ;;  %v828_v59 = vmul.f32 %v1657_v24, %v2197_v26  ;;  %v1660_v23 = vadd.f32 %v1659_v18, %v1658_v51  ;;  %v1160_v52 = vmax.f32 %v1128_v11, 0.0 }
 0x26c   :  { %v1161_v56 = vmax.f32 %v1129_v53, 0.0  ;;  %v867_v17 = vadd.f32 %v2214_v41, %v828_v59  ;;  %v829_v58 = vmul.f32 %v1660_v23, %v2195_v25 }
 0x26e   :  { %v1503_v55 = vpack.c.bf16 %v1161_v56, %v1160_v52  ;;  %v1091_v4 = vmul.f32 %v1054_v27, %v867_v17  ;;  %v868_v33 = vadd.f32 %v2214_v41, %v829_v58 }
 0x270   :  { %1523 = vst [vmem:[#allocation2 + $0x70] sm:$0xff] %v1503_v55   ;;  %v1130_v10 = vadd.f32 %v2221_v54, %v1091_v4  ;;  %v1092_v0 = vmul.f32 %v1059_v2, %v868_v33 }
 0x272   :  { %v1131_v34 = vadd.f32 %v2221_v54, %v1092_v0  ;;  %v1162_v26 = vmax.f32 %v1130_v10, 0.0 }
 0x274   :  { %v1163_v8 = vmax.f32 %v1131_v34, 0.0 }
 0x276   :  { %v1508_v14 = vpack.c.bf16 %v1163_v8, %v1162_v26 }
 0x278   :  { %1524 = vst [vmem:[#allocation2 + $0x78] sm:$0xff] %v1508_v14  }
 0x279   :  { %1766 = shalt.err (!%p1763_p4)
}
 0x27a   :  { %s1767_s10 = scalar_lea.hbm %s2338_s7, 2048 }
 0x27b   :  { %p1768_p5 = scmp.ne.s32.totalorder %s2338_s7, %s1767_s10  ;;  %p1771_p6 = scmp.lt.u32.totalorder %s1767_s10, %s2338_s7 }
 0x27d   :  { %p1773_p7 = pnand %p1771_p6, %p1768_p5 }
 0x27f   :  { %1776 = shalt.err (!%p1773_p7)
}
 0x280   :  { %s1781_s15 = smov 64   ;;  %s1782_s16 = smov 4  }
 0x281   :  { %1335 = dma.vmem_to_hbm [thread:$0]  %s1330_s4, 2048, %s2338_s7, [#allocation3], %s1781_s15, %s1781_s15, %s1782_s16  }
 0x282   :  { %1777 = dma.done.wait [#allocation3], 2048  }
 0x283   :  { %1778 = vsyncadd [#allocation3], 4294965248 }
 0x284   :  { %1339 = vsyncpa [#allocation3], 1 }

</bundles_post_ra>
